<compile_context>
chip_gen: v6e
topology: v6e:2x2x1
jax: 0.10.0
libtpu: 0.0.40
codegen_flags: <defaults>
</compile_context>

<pallas_src>
import numpy as np
import jax
import jax.numpy as jnp
from jax.experimental import pallas as pl
from jax.experimental.pallas import tpu as pltpu


# ----------------------------------------------------------------------------
# Base anchors (AnchorGenerator.generate_anchors) — static, computed in numpy.
# ----------------------------------------------------------------------------
def _generate_base_anchors_np(scales, aspect_ratios, xyxy=True):
    scales = np.asarray(scales, np.float32)
    ar = np.asarray(aspect_ratios, np.float32)
    h_ratios = np.sqrt(ar)
    w_ratios = np.float32(1.0) / h_ratios
    ws = (w_ratios[:, None] * scales[None, :]).reshape(-1)
    hs = (h_ratios[:, None] * scales[None, :]).reshape(-1)
    if xyxy:
        base = np.stack([-ws, -hs, ws, hs], axis=1) / 2.0
    else:
        z = np.zeros_like(ws)
        base = np.stack([z, z, ws, hs], axis=1) / 2.0
    return np.round(base).astype(np.float32)   # (A, 4)


# ----------------------------------------------------------------------------
# Trace-time per-level constants (numpy).
#   Level output (flat index e = w*AC + r inside a row):  row_f * D[e] + C[e]
# ----------------------------------------------------------------------------
def _level_params_np(base_np, W, stride_w, img_h, img_w, xyxy):
    A = base_np.shape[0]
    AC = A * 4
    c_idx = np.tile(np.arange(4), A)
    is_x = (c_idx % 2) == 0
    # Mirror the PyTorch module exactly: columns 0/2 divided by image_size[0]
    # (height) and columns 1/3 by image_size[1] (width).
    inv_div = np.where(is_x, 1.0 / float(img_h), 1.0 / float(img_w))
    if xyxy:
        xsel = is_x.astype(np.float64)
        ysel = (~is_x).astype(np.float64)
    else:
        # xywh mode: only coords 0/1 receive the spatial shift.
        xsel = (c_idx == 0).astype(np.float64)
        ysel = (c_idx == 1).astype(np.float64)
    base_flat = base_np.reshape(-1).astype(np.float64)

    shift_x = np.arange(W, dtype=np.float64) * float(stride_w)          # (W,)
    C = (shift_x[:, None] * xsel[None, :] + base_flat[None, :]) * inv_div[None, :]
    D = np.broadcast_to(ysel * inv_div, (W, AC))
    C = C.reshape(-1).astype(np.float32)                                # (W*AC,)
    D = np.ascontiguousarray(D).reshape(-1).astype(np.float32)          # (W*AC,)
    return C, D


# ----------------------------------------------------------------------------
# Tile sizing: ~2 MiB output blocks, rows a multiple of the sublane tile (or
# the full H), and >=2 grid steps when possible so v7x megacore gets both TCs.
# ----------------------------------------------------------------------------
def _pick_tile_h(H, row_bytes, sub, target_bytes=2 << 20):
    t = max(1, int(target_bytes // row_bytes))
    if t >= H:
        half = H // 2
        if half >= sub and half % sub == 0:
            return half                       # 2 parallel grid steps
        return H                              # single full-extent block
    steps = -(-H // t)                        # balance the grid steps
    t = -(-H // steps)
    t = -(-t // sub) * sub                    # round up to sublane multiple
    return min(t, H)


# ----------------------------------------------------------------------------
# Pallas kernel for one feature-map level (lane-dense, one FMA per block).
# ----------------------------------------------------------------------------
def _make_level_kernel(stride_h, tile_h):
    sh = float(stride_h)

    def kernel(params_ref, out_ref):
        # params_ref: (2, 1, RW) f32, rows = [C, D]   (single DMA: block index
        #             never changes across the grid)
        # out_ref   : (tile_h, RW) in the target dtype (lane-dense)
        i = pl.program_id(0)
        c = params_ref[0]                                     # (1, RW)
        d = params_ref[1]                                     # (1, RW)
        row = jax.lax.broadcasted_iota(jnp.int32, (tile_h, 1), 0)
        row_f = (row + i * tile_h).astype(jnp.float32) * jnp.float32(sh)
        # Single vectorized broadcast FMA + full-tile store (2 VALU ops/elem).
        out_ref[...] = (row_f * d + c).astype(out_ref.dtype)

    return kernel


def _level_anchors_pallas(C, D, H, W, A, stride_h, dtype):
    RW = W * A * 4
    params = jnp.asarray(np.stack([C, D], axis=0).reshape(2, 1, RW), jnp.float32)

    itemsize = int(jnp.dtype(dtype).itemsize)
    sub = {4: 8, 2: 16, 1: 32}.get(itemsize, 8)
    tile_h = _pick_tile_h(H, RW * itemsize, sub)
    grid = ((H + tile_h - 1) // tile_h,)

    kernel = _make_level_kernel(stride_h, tile_h)
    # Output blocks are <= ~2 MiB; double-buffered that is ~4 MiB, well inside
    # every generation's default scoped VMEM limit (no vmem_limit_bytes needed).
    out = pl.pallas_call(
        kernel,
        out_shape=jax.ShapeDtypeStruct((H, RW), dtype),
        grid=grid,
        in_specs=[pl.BlockSpec((2, 1, RW), lambda i: (0, 0, 0))],
        out_specs=pl.BlockSpec((tile_h, RW), lambda i: (i, 0)),
        compiler_params=pltpu.CompilerParams(
            dimension_semantics=("parallel",)),
    )(params)

    # (H, W*A*4) row-major is bit-identical to (H*W*A, 4): free reshape,
    # no transpose / cast pass.
    return out.reshape(H * W * A, 4)


def _level_anchors_const(C, D, H, W, A, stride_h, dtype):
    # Tiny level: per-call launch overhead dwarfs the few KiB of output, so
    # bake it as a trace-time constant (same formula as the kernel).
    rows = (np.arange(H, dtype=np.float32) * np.float32(stride_h))[:, None]
    out = rows * D[None, :] + C[None, :]                     # (H, RW)
    return jnp.asarray(out.reshape(H * W * A, 4), dtype)


# ----------------------------------------------------------------------------
# Forward (AnchorGenerator.forward)
# ----------------------------------------------------------------------------
def anchor_generator_forward(image_size, feature_maps, sizes, aspect_ratios,
                             xyxy=True, min_kernel_bytes=16 * 1024):
    if not isinstance(sizes[0], (list, tuple)):
        sizes = tuple((s,) for s in sizes)
    if not isinstance(aspect_ratios[0], (list, tuple)):
        aspect_ratios = (aspect_ratios,) * len(sizes)
    assert len(sizes) == len(aspect_ratios)

    dtype = feature_maps[0].dtype
    batch = feature_maps[0].shape[0]
    img_h, img_w = int(image_size[0]), int(image_size[1])

    per_level = []
    for fmap, scales, ars in zip(feature_maps, sizes, aspect_ratios):
        H, W = int(fmap.shape[-2]), int(fmap.shape[-1])
        stride_h = img_h // H
        stride_w = img_w // W
        base = _generate_base_anchors_np(scales, ars, xyxy)
        A = base.shape[0]
        C, D = _level_params_np(base, W, stride_w, img_h, img_w, xyxy)

        level_bytes = H * W * A * 4 * int(jnp.dtype(dtype).itemsize)
        if level_bytes < min_kernel_bytes:
            per_level.append(_level_anchors_const(C, D, H, W, A, stride_h, dtype))
        else:
            per_level.append(_level_anchors_pallas(C, D, H, W, A, stride_h, dtype))

    # TODO(synk): the trailing concatenate re-copies the whole anchor tensor
    # through HBM; writing each level directly into a preallocated flat buffer
    # needs element-offset output indexing (or per-level offsets that happen to
    # be multiples of the level block size), which is not guaranteed for
    # arbitrary pyramids, so it is left as plain JAX here.
    all_levels = jnp.concatenate(per_level, axis=0)

    # Identical anchors for every image in the batch (list of length N).
    return [all_levels for _ in range(batch)]


# ----------------------------------------------------------------------------
# Pure-numpy reference (mirrors the PyTorch code) for verification.
# ----------------------------------------------------------------------------
def _reference(image_size, feat_shapes, sizes, aspect_ratios):
    outs = []
    for (H, W), scales, ars in zip(feat_shapes, sizes, aspect_ratios):
        scales = np.asarray(scales, np.float32)
        ars = np.asarray(ars, np.float32)
        h_r = np.sqrt(ars)
        w_r = 1.0 / h_r
        ws = (w_r[:, None] * scales[None, :]).reshape(-1)
        hs = (h_r[:, None] * scales[None, :]).reshape(-1)
        base = np.round(np.stack([-ws, -hs, ws, hs], 1) / 2.0).astype(np.float32)

        sh = image_size[0] // H
        sw = image_size[1] // W
        sx = np.arange(W, dtype=np.int64) * sw
        sy = np.arange(H, dtype=np.int64) * sh
        yy, xx = np.meshgrid(sy, sx, indexing="ij")
        xx = xx.reshape(-1)
        yy = yy.reshape(-1)
        shifts = np.stack([xx, yy, xx, yy], 1).astype(np.float32)
        a = (shifts[:, None, :] + base[None, :, :]).reshape(-1, 4)
        a[:, 0::2] /= image_size[0]
        a[:, 1::2] /= image_size[1]
        outs.append(a)
    return np.concatenate(outs, 0)


if __name__ == "__main__":
    key = jax.random.PRNGKey(0)
    k1, k2 = jax.random.split(key)

    # Non-square image to exercise the module's x/height, y/width normalization.
    image_size = (64, 128)
    # Two feature-map levels, NCHW, batch=2, channels=4.
    fm0 = jax.random.normal(k1, (2, 4, 16, 16), dtype=jnp.float32)   # -> Pallas kernel
    fm1 = jax.random.normal(k2, (2, 4, 8, 8), dtype=jnp.float32)     # -> tiny: constant-folded
    feature_maps = [fm0, fm1]

    sizes = ((32, 64), (128, 256))
    aspect_ratios = ((0.5, 1.0, 2.0), (0.5, 1.0, 2.0))

    anchors = anchor_generator_forward(image_size, feature_maps,
                                       sizes, aspect_ratios, xyxy=True)
    anchors = [jax.block_until_ready(a) for a in anchors]

    ref = _reference(image_size, [(16, 16), (8, 8)], sizes, aspect_ratios)
    assert len(anchors) == 2
    for a in anchors:
        assert a.shape == ref.shape, (a.shape, ref.shape)
        np.testing.assert_allclose(np.asarray(a), ref, rtol=1e-5, atol=1e-5)

    print("KERNEL_OK")
</pallas_src>

<mosaic_0001>
module attributes {stable_mosaic.version = 11 : i64} {
  func.func @kernel(%arg0: i32, %arg1: memref<2x1x384xf32, #tpu.memory_space<vmem>>, %arg2: memref<8x384xf32, #tpu.memory_space<vmem>>) attributes {dimension_semantics = [#tpu.dimension_semantics<parallel>], iteration_bounds = array<i64: 2>, scalar_prefetch = 0 : i64, scratch_operands = 0 : i64, tpu.core_type = #tpu.core_type<tc>, window_params = [{pipeline_mode = #tpu.pipeline_mode<synchronous>, transform_indices = @transform_0, window_bounds = array<i64: 2, 1, 384>}, {transform_indices = @transform_1, window_bounds = array<i64: 8, 384>}]} {
    %c0 = arith.constant 0 : index
    %c0_0 = arith.constant 0 : index
    %c0_1 = arith.constant 0 : index
    %0 = vector.load %arg1[%c0, %c0_0, %c0_1] : memref<2x1x384xf32, #tpu.memory_space<vmem>>, vector<1x1x384xf32>
    %1 = vector.shape_cast %0 : vector<1x1x384xf32> to vector<1x384xf32>
    %c1 = arith.constant 1 : index
    %c0_2 = arith.constant 0 : index
    %c0_3 = arith.constant 0 : index
    %2 = vector.load %arg1[%c1, %c0_2, %c0_3] : memref<2x1x384xf32, #tpu.memory_space<vmem>>, vector<1x1x384xf32>
    %3 = vector.shape_cast %2 : vector<1x1x384xf32> to vector<1x384xf32>
    %4 = tpu.iota {dimensions = array<i32: 0>} : vector<8x1xi32>
    %c8_i32 = arith.constant 8 : i32
    %5 = arith.muli %arg0, %c8_i32 : i32
    %6 = vector.broadcast %5 : i32 to vector<8x1xi32>
    %7 = arith.addi %4, %6 : vector<8x1xi32>
    %8 = arith.sitofp %7 : vector<8x1xi32> to vector<8x1xf32>
    %cst = arith.constant 4.000000e+00 : f32
    %9 = vector.broadcast %cst : f32 to vector<8x1xf32>
    %10 = arith.mulf %8, %9 : vector<8x1xf32>
    %11 = vector.broadcast %10 : vector<8x1xf32> to vector<8x384xf32>
    %12 = vector.broadcast %3 : vector<1x384xf32> to vector<8x384xf32>
    %13 = arith.mulf %11, %12 : vector<8x384xf32>
    %14 = vector.broadcast %1 : vector<1x384xf32> to vector<8x384xf32>
    %15 = arith.addf %13, %14 : vector<8x384xf32>
    %c0_4 = arith.constant 0 : index
    %c0_5 = arith.constant 0 : index
    %16 = vector.load %arg2[%c0_4, %c0_5] : memref<8x384xf32, #tpu.memory_space<vmem>>, vector<8x384xf32>
    tpu.vector_store %arg2[%c0_4, %c0_5], %15 {strides = array<i32>} : memref<8x384xf32, #tpu.memory_space<vmem>>, vector<8x384xf32>,
    return
  }
  func.func @transform_0(%arg0: i32) -> (i32, i32, i32) {
    %c0_i32 = arith.constant 0 : i32
    %c0_i32_0 = arith.constant 0 : i32
    %c0_i32_1 = arith.constant 0 : i32
    %c0_i32_2 = arith.constant 0 : i32
    return %c0_i32, %c0_i32_0, %c0_i32_1 : i32, i32, i32
  }
  func.func @transform_1(%arg0: i32) -> (i32, i32) {
    %c0_i32 = arith.constant 0 : i32
    %c0_i32_0 = arith.constant 0 : i32
    return %arg0, %c0_i32 : i32, i32
  }
}

</mosaic_0001>

<bundles_post_ra>
// kernel: tpu_custom_call.1
= control target key start
LH: loop header
LB: loop body
LE: loop exit
PB: predicated region body
PF: predicated region fallthrough
CT: control target
= control target key end

     0   :  { %6 = vsyncpa [#allocation3], 0  ;;  %s521_s0 = inlined_call_operand.hbm [shape: f32[2,1,384], index: 0, kind: input, shape index: {}]   ;;  %s522_s1 = inlined_call_operand.hbm [shape: f32[16,384], index: 1, kind: output, shape index: {}]  }
   0x1   :  { %7 = vsyncpa [#allocation4], 0 }
   0x2   :  { %9 = vsyncpa [#allocation4 + $0x1], 0  ;;  %s404_s6 = smov 0   ;;  %s406_s7 = smov 0  }
   0x3   :  { %s408_s8 = smov 0   ;;  %s410_s9 = smov 0  }
   0x4 LB: > { %s425_s10 = sadd.s32 4294967295, %s388_s9   ;;  %s235_s11 = sadd.s32 4294967294, %s388_s9   ;;  %s388_s9 = sphi %s410_s9, %s530_s9   ;;  %s384_s8 = sphi %s408_s8, %s529_s8   ;;  %s380_s7 = sphi %s406_s7, %s528_s7   ;;  %s376_s6 = sphi %s404_s6, %s527_s6  }
   0x5   : > { %s429_s12 = sadd.s32 1, %s388_s9   ;;  %s43_s13 = sadd.s32 1, %s384_s8 }
   0x6   : > { %s40_s14 = ssub.s32 %s388_s9, %s429_s12  ;;  %p53_p0 = scmp.ne.s32.totalorder %s384_s8, %s380_s7 }
   0x7   : > { %p41_p1 = scmp.eq.s32.totalorder %s40_s14, 0  ;;  %p54_p2 = scmp.eq.s32.totalorder %s425_s10, 1 }
   0x8   : > { %p59_p3 = scmp.ne.s32.totalorder %s380_s7, %s376_s6  ;;  %p60_p4 = scmp.eq.s32.totalorder %s235_s11, 1 }
   0x9   : > { %s440_s15 = scalar_select %p41_p1, %s384_s8, %s43_s13  }
   0xa   : > { %p442_p5 = por %p54_p2, %p53_p0  ;;  %p446_p6 = por %p60_p4, %p59_p3 }
   0xb   : > { %p236_p7 = scmp.ge.s32.totalorder %s388_s9, 1  ;;  %p67_p8 = scmp.lt.s32.totalorder %s388_s9, 3 }
   0xc   : > { %s524_s17 = scalar_select %p446_p6, 1, 0 }
   0xd   : > { %p260_p9 = scmp.eq.s32.totalorder %s425_s10, 0  ;;  %p453_p10 = pnand %p236_p7, %p67_p8 }
   0xe   : > { %s390_s19 = smov [#allocation2]  }
   0xf   : > { %s79_s20 = sshll.u32 %s390_s19, 4  ;;  %p252_p11 = pneg %p453_p10  ;;  %s80_s20 = int_to_ptr.vmem [resolvable:$true] %s79_s20 }
  0x10   : > { %s309_s21 = scalar_lea.vmem %s80_s20, 96  ;;  %p317_p3 = scmp.lt.s32.totalorder %s80_s20, %s80_s20 }
  0x11   : > { %p253_p12 = pnand %p260_p9, %p252_p11  ;;  %p310_p0 = scmp.ne.s32.totalorder %s80_s20, %s309_s21 }
  0x12   : > { %p318_p4 = scmp.lt.s32.totalorder %s309_s21, %s309_s21 }
  0x13   : > { %p300_p13 = pneg %p253_p12 }
  0x14   : > { %p319_p6 = por %p318_p4, %p317_p3 }
  0x15   : > { %p312_p1 = pnand %p310_p0, %p300_p13 }
  0x17   : > { %p313_p2 = pneg %p312_p1 }
  0x19   : > { %p320_p7 = pnand %p319_p6, %p313_p2 }
  0x1b   : > { %323 = shalt.err (!%p320_p7)
}
  0x1c   : > { %s391_s22 = smov 48   ;;  %s392_s23 = smov 3  }
  0x1d   : > { %255 = dma.hbm_to_vmem [thread:$0]  (!%p253_p12), %s521_s0, 96, %s80_s20, [#allocation3], %s391_s22, %s391_s22, %s392_s23  }
  0x1e   : > { %95 = sbr.rel (%p453_p10) target bundleno = 64 (0x40), region = 24 }
  0x23   : > { %367 = dma.done.wait (%p260_p9), [#allocation3], 96  }
  0x24   : > { %369 = vsyncadd (%p260_p9), [#allocation3], 4294967200  ;;  %s107_s26 = sand.u32 1, %s380_s7   ;;  %v113_v0 = vlaneseq  ;;  %s240_s27 = sshll.u32 %s425_s10, 3  ;;  %v110_v8 = vld [vmem:[#allocation2] sm:$0x7] }
  0x25   : > { %v116_v1 = vstv %s240_s27  ;;  %s244_s28 = smul.u32 24, %s107_s26  ;;  %v112_v9 = vld [vmem:[#allocation2 + $0x3] sm:$0x7]  ;;  %s393_s13 = smov [#allocation5]  }
  0x26   : > { %v114_v2 = vshrl.u32 %v113_v0, 7  ;;  %s245_s29 = smul.u32 384, %s425_s10  ;;  %s162_s10 = scalar_lea.sflag [#allocation4], %s107_s26 }
  0x27   : > { %s109_s30 = scalar_lea.vmem [#allocation5], %s244_s28  ;;  %s328_s14 = sshll.u32 %s393_s13, 4  ;;  %s329_s14 = int_to_ptr.vmem [resolvable:$false] %s328_s14 }
  0x28   : > { %v117_v3 = vadd.s32 %v116_v1, %v114_v2  ;;  %v123_v4 = vsub.s32 0, %v114_v2  ;;  %v127_v5 = vsub.s32 1, %v114_v2  ;;  %v131_v6 = vsub.s32 2, %v114_v2  ;;  %s176_s2 = sshll.u32 %s109_s30, 4  ;;  %s480_s5 = scalar_lea.hbm %s522_s1, %s245_s29  ;;  %s475_s2 = int_to_ptr.vmem [resolvable:$true] %s176_s2 }
  0x29   : > { %s324_s11 = scalar_lea.vmem %s475_s2, 384  ;;  %s330_s18 = scalar_lea.vmem %s329_s14, 768 }
  0x2a   : > { %v118_v7 = vcvt.s32.f32 %v117_v3  ;;  %v124_v11 = vrot.slane %v112_v9, %v123_v4  ;;  %v143_v12 = vrot.slane %v110_v8, %v123_v4  ;;  %v128_v13 = vrot.slane %v112_v9, %v127_v5  ;;  %p325_p6 = scmp.ne.s32.totalorder %s475_s2, %s324_s11  ;;  %p331_p10 = scmp.lt.s32.totalorder %s475_s2, %s329_s14 }
  0x2b   : > { %v147_v14 = vrot.slane %v110_v8, %v127_v5  ;;  %v132_v15 = vrot.slane %v112_v9, %v131_v6  ;;  %v151_v16 = vrot.slane %v110_v8, %v131_v6  ;;  %p332_p11 = scmp.lt.s32.totalorder %s330_s18, %s324_s11 }
  0x2c   : > { %v119_v10 = vmul.f32 4.0, %v118_v7  ;;  %p326_p8 = pnand %p325_p6, %p442_p5 }
  0x2d   : > { %p333_p12 = por %p332_p11, %p331_p10 }
  0x2e   : > { %v136_v17 = vmul.f32 %v124_v11, %v119_v10  ;;  %v137_v18 = vmul.f32 %v128_v13, %v119_v10  ;;  %v138_v19 = vmul.f32 %v132_v15, %v119_v10  ;;  %p327_p9 = pneg %p326_p8 }
  0x30   : > { %v155_v20 = vadd.f32 %v143_v12, %v136_v17  ;;  %v156_v21 = vadd.f32 %v147_v14, %v137_v18  ;;  %v157_v22 = vadd.f32 %v151_v16, %v138_v19  ;;  %p334_p13 = pnand %p333_p12, %p327_p9 }
  0x32   : > { %158 = vst [vmem:[%s109_s30] sm:$0xff] %v155_v20  ;;  %159 = vst [vmem:[%s109_s30 + $0x8] sm:$0xff] %v156_v21 }
  0x33   : > { %160 = vst [vmem:[%s109_s30 + $0x10] sm:$0xff] %v157_v22 }
  0x34   : > { %337 = shalt.err (!%p334_p13)
}
  0x35   : > { %s338_s19 = scalar_lea.hbm %s480_s5, 384  ;;  %s342_s22 = scalar_lea.hbm %s522_s1, 768 }
  0x36   : > { %p339_p0 = scmp.ne.s32.totalorder %s480_s5, %s338_s19  ;;  %p343_p3 = scmp.lt.s32.totalorder %s480_s5, %s522_s1 }
  0x37   : > { %p344_p4 = scmp.lt.s32.totalorder %s342_s22, %s338_s19 }
  0x38   : > { %p340_p1 = pnand %p339_p0, %p442_p5 }
  0x39   : > { %p345_p7 = por %p344_p4, %p343_p3 }
  0x3a   : > { %p341_p2 = pneg %p340_p1 }
  0x3c   : > { %p346_p6 = pnand %p345_p7, %p341_p2 }
  0x3e   : > { %349 = shalt.err (!%p346_p6)
}
  0x3f   : > { %250 = dma.vmem_to_hbm [thread:$0]  (%p442_p5), %s475_s2, 384, %s480_s5, %s162_s10  }
  0x40 PF: > { %p262_p8 = scmp.ge.s32.totalorder %s388_s9, 2  ;;  %s188_s25 = sand.u32 1, %s376_s6  }
  0x41   : > { %p526_p9 = scmp.ne.s32.totalorder %s524_s17, 0  ;;  %s189_s26 = scalar_lea.sflag [#allocation4], %s188_s25 }
  0x43   : > { %p257_p10 = pnand %p262_p8, %p526_p9 }
  0x45   : > { %p258_p11 = pneg %p257_p10 }
  0x47   : > { %371 = dma.done.wait (%p258_p11), %s189_s26, 384  }
  0x48   : > { %373 = vsyncadd (%p258_p11), %s189_s26, 4294966912  ;;  %p12_p12 = scmp.ge.s32.totalorder %s429_s12, 4   ;;  %s527_s6 = smov %s380_s7 }
  0x49   : > { %s528_s7 = smov %s384_s8  ;;  %s529_s8 = smov %s440_s15 }
  0x4a   : > { %s530_s9 = smov %s429_s12  ;;  %14 = sbr.rel (!%p12_p12) target bundleno = 4 (0x4), region = 62 }
  0x4f   :  { %194 = vsyncpa [#allocation3], 1 }
  0x50   :  { %196 = vsyncpa [#allocation3 + $0x1], 1 }
  0x51   :  { %197 = vsyncpa [#allocation4], 1 }
  0x52   :  { %199 = vsyncpa [#allocation4 + $0x1], 1 }

</bundles_post_ra>
